<compile_context>
chip_gen: v7x
topology: tpu7x:2x2x1
jax: 0.10.0
libtpu: 0.0.40
codegen_flags: <defaults>
</compile_context>

<pallas_src>
import math
import jax
import jax.numpy as jnp
from jax.experimental import pallas as pl
from jax.experimental.pallas import tpu as pltpu


def critic_kernel(x_ref, w1_ref, b1_ref, w2_ref, b2_ref, w3_ref, b3_ref, o_ref):
    # x_ref:  (S, TILE_B) bf16   feature-major input tile (batch on lanes)
    # w1_ref: (W, S) bf16, w2_ref: (W, W) bf16   -- PyTorch [out, in] layout
    # b1_ref, b2_ref, w3_ref: (W, 1) f32 columns; b3_ref: (1,) f32 in SMEM
    # o_ref:  (1, TILE_B) f32    lane-dense value slab

    # C1: canonical MXU matmul (W, S) @ (S, TILE_B) -> (W, TILE_B), f32 acc.
    h1 = jnp.dot(w1_ref[...], x_ref[...], preferred_element_type=jnp.float32)
    h1 = jnp.tanh(h1 + b1_ref[...])                      # f32 bias/tanh (v5e-safe)

    # C2: (W, W) @ (W, TILE_B); feed the MXU in bf16, accumulate in f32.
    h2 = jnp.dot(w2_ref[...], h1.astype(w2_ref.dtype),
                 preferred_element_type=jnp.float32)
    h2 = jnp.tanh(h2 + b2_ref[...])

    # C3 (value head, out dim 1): VPU multiply + sublane reduce instead of an
    # N=1 MXU matmul; scalar bias comes from SMEM.
    v = jnp.sum(w3_ref[...] * h2, axis=0, keepdims=True) + b3_ref[0]

    o_ref[...] = v.astype(o_ref.dtype)


def critic_forward(state, params, *, tile_b=512):
    """state: [B, state_dim] float32 -> value: [B, 1] float32."""
    w1, b1, w2, b2, w3, b3 = params
    B, S = state.shape
    W = w1.shape[0]

    num_tiles = pl.cdiv(B, tile_b)
    b_pad = num_tiles * tile_b

    # Feature-major, lane-dense, bf16 input stream.  No explicit batch pad:
    # Pallas clips the DMA of the ragged last tile; garbage lanes are sliced
    # off after the call.
    x = state.T.astype(jnp.bfloat16)            # (S, B)
    w1b = w1.astype(jnp.bfloat16)
    w2b = w2.astype(jnp.bfloat16)

    out = pl.pallas_call(
        critic_kernel,
        out_shape=jax.ShapeDtypeStruct((1, b_pad), jnp.float32),
        grid=(num_tiles,),
        in_specs=[
            # activation stream: tiled over the batch (lane axis), pipelined
            pl.BlockSpec((S, tile_b), lambda i: (0, i)),
            # weights/biases: constant index_map -> resident in VMEM across steps
            pl.BlockSpec((W, S), lambda i: (0, 0)),
            pl.BlockSpec((W, 1), lambda i: (0, 0)),
            pl.BlockSpec((W, W), lambda i: (0, 0)),
            pl.BlockSpec((W, 1), lambda i: (0, 0)),
            pl.BlockSpec((W, 1), lambda i: (0, 0)),
            # flat scalar value-head bias lives in SMEM
            pl.BlockSpec(memory_space=pltpu.MemorySpace.SMEM),
        ],
        out_specs=pl.BlockSpec((1, tile_b), lambda i: (0, i)),
        compiler_params=pltpu.CompilerParams(
            dimension_semantics=("parallel",),
            vmem_limit_bytes=32 * 1024 * 1024,
        ),
    )(x, w1b, b1, w2b, b2, w3, b3)

    # lane-dense (1, B_pad) slab -> [B, 1] (layout plumbing only)
    return out.reshape(b_pad, 1)[:B]


def init_critic_params(key, state_dim, net_width):
    """Deterministic init mirroring nn.Linear's default uniform(-1/sqrt(fan_in), +)."""
    ks = jax.random.split(key, 6)

    def linear(kw, kb, fan_in, fan_out):
        bound = 1.0 / math.sqrt(fan_in)
        w = jax.random.uniform(kw, (fan_out, fan_in), jnp.float32, -bound, bound)
        b = jax.random.uniform(kb, (fan_out, 1), jnp.float32, -bound, bound)
        return w, b

    w1, b1 = linear(ks[0], ks[1], state_dim, net_width)
    w2, b2 = linear(ks[2], ks[3], net_width, net_width)
    w3_row, b3_col = linear(ks[4], ks[5], net_width, 1)   # (1, net_width), (1, 1)
    w3 = w3_row.T                                          # column (net_width, 1)
    b3 = b3_col.reshape(1)                                 # flat (1,) for SMEM
    return (w1, b1, w2, b2, w3, b3)


def critic_reference(state, params):
    w1, b1, w2, b2, w3, b3 = params
    h = jnp.tanh(state @ w1.T + b1.T)
    h = jnp.tanh(h @ w2.T + b2.T)
    return h @ w3 + b3


if __name__ == "__main__":
    key = jax.random.PRNGKey(0)
    k_param, k_state = jax.random.split(key)

    batch, state_dim, net_width = 8, 8, 32

    params = init_critic_params(k_param, state_dim, net_width)
    state = jax.random.normal(k_state, (batch, state_dim), dtype=jnp.float32)

    out = critic_forward(state, params)
    out = jax.block_until_ready(out)

    ref = critic_reference(state, params)
    assert out.shape == (batch, 1), out.shape
    # bf16 inputs/weights on the MXU path -> relaxed tolerance vs the f32 reference.
    assert jnp.allclose(out, ref, atol=3e-2, rtol=3e-2), (out, ref)

    print("KERNEL_OK")
</pallas_src>

<mosaic_0001>
module attributes {stable_mosaic.version = 11 : i64} {
  func.func @critic_kernel(%arg0: i32, %arg1: memref<8x512xbf16, #tpu.memory_space<vmem>>, %arg2: memref<32x8xbf16, #tpu.memory_space<vmem>>, %arg3: memref<32x1xf32, #tpu.memory_space<vmem>>, %arg4: memref<32x32xbf16, #tpu.memory_space<vmem>>, %arg5: memref<32x1xf32, #tpu.memory_space<vmem>>, %arg6: memref<32x1xf32, #tpu.memory_space<vmem>>, %arg7: memref<1xf32, #tpu.memory_space<smem>>, %arg8: memref<1x512xf32, #tpu.memory_space<vmem>>) attributes {dimension_semantics = [#tpu.dimension_semantics<parallel>], iteration_bounds = array<i64: 1>, scalar_prefetch = 0 : i64, scratch_operands = 0 : i64, tpu.core_type = #tpu.core_type<tc>, window_params = [{transform_indices = @transform_0, window_bounds = array<i64: 8, 512>}, {pipeline_mode = #tpu.pipeline_mode<synchronous>, transform_indices = @transform_1, window_bounds = array<i64: 32, 8>}, {pipeline_mode = #tpu.pipeline_mode<synchronous>, transform_indices = @transform_2, window_bounds = array<i64: 32, 1>}, {pipeline_mode = #tpu.pipeline_mode<synchronous>, transform_indices = @transform_3, window_bounds = array<i64: 32, 32>}, {pipeline_mode = #tpu.pipeline_mode<synchronous>, transform_indices = @transform_4, window_bounds = array<i64: 32, 1>}, {pipeline_mode = #tpu.pipeline_mode<synchronous>, transform_indices = @transform_5, window_bounds = array<i64: 32, 1>}, {transform_indices = @transform_6, window_bounds = array<i64: 1>}, {transform_indices = @transform_7, window_bounds = array<i64: 1, 512>}]} {
    %c0 = arith.constant 0 : index
    %c0_0 = arith.constant 0 : index
    %0 = vector.load %arg2[%c0, %c0_0] : memref<32x8xbf16, #tpu.memory_space<vmem>>, vector<32x8xbf16>
    %c0_1 = arith.constant 0 : index
    %c0_2 = arith.constant 0 : index
    %1 = vector.load %arg1[%c0_1, %c0_2] : memref<8x512xbf16, #tpu.memory_space<vmem>>, vector<8x512xbf16>
    %cst = arith.constant dense<0.000000e+00> : vector<32x512xf32>
    %2 = tpu.matmul %0, %1, %cst {dimension_numbers = #tpu.dot_dimension_numbers<[1], [0], [0], [1], [0, 0, 1, 1], [], []>} : vector<32x8xbf16>, vector<8x512xbf16>, vector<32x512xf32> -> vector<32x512xf32>
    %c0_3 = arith.constant 0 : index
    %c0_4 = arith.constant 0 : index
    %3 = vector.load %arg3[%c0_3, %c0_4] : memref<32x1xf32, #tpu.memory_space<vmem>>, vector<32x1xf32>
    %4 = vector.broadcast %3 : vector<32x1xf32> to vector<32x512xf32>
    %5 = arith.addf %2, %4 : vector<32x512xf32>
    %6 = math.tanh %5 : vector<32x512xf32>
    %c0_5 = arith.constant 0 : index
    %c0_6 = arith.constant 0 : index
    %7 = vector.load %arg4[%c0_5, %c0_6] : memref<32x32xbf16, #tpu.memory_space<vmem>>, vector<32x32xbf16>
    %8 = arith.truncf %6 : vector<32x512xf32> to vector<32x512xbf16>
    %cst_7 = arith.constant dense<0.000000e+00> : vector<32x512xf32>
    %9 = tpu.matmul %7, %8, %cst_7 {dimension_numbers = #tpu.dot_dimension_numbers<[1], [0], [0], [1], [0, 0, 1, 1], [], []>} : vector<32x32xbf16>, vector<32x512xbf16>, vector<32x512xf32> -> vector<32x512xf32>
    %c0_8 = arith.constant 0 : index
    %c0_9 = arith.constant 0 : index
    %10 = vector.load %arg5[%c0_8, %c0_9] : memref<32x1xf32, #tpu.memory_space<vmem>>, vector<32x1xf32>
    %11 = vector.broadcast %10 : vector<32x1xf32> to vector<32x512xf32>
    %12 = arith.addf %9, %11 : vector<32x512xf32>
    %13 = math.tanh %12 : vector<32x512xf32>
    %c0_10 = arith.constant 0 : index
    %c0_11 = arith.constant 0 : index
    %14 = vector.load %arg6[%c0_10, %c0_11] : memref<32x1xf32, #tpu.memory_space<vmem>>, vector<32x1xf32>
    %15 = vector.broadcast %14 : vector<32x1xf32> to vector<32x512xf32>
    %16 = arith.mulf %15, %13 : vector<32x512xf32>
    %cst_12 = arith.constant dense<0.000000e+00> : vector<512xf32>
    %17 = vector.multi_reduction <add>, %16, %cst_12 [0] : vector<32x512xf32> to vector<512xf32>
    %18 = vector.shape_cast %17 : vector<512xf32> to vector<1x512xf32>
    %c0_13 = arith.constant 0 : index
    %19 = memref.load %arg7[%c0_13] : memref<1xf32, #tpu.memory_space<smem>>
    %20 = vector.broadcast %19 : f32 to vector<1x512xf32>
    %21 = arith.addf %18, %20 : vector<1x512xf32>
    %c0_14 = arith.constant 0 : index
    %c0_15 = arith.constant 0 : index
    %22 = vector.load %arg8[%c0_14, %c0_15] : memref<1x512xf32, #tpu.memory_space<vmem>>, vector<1x512xf32>
    tpu.vector_store %arg8[%c0_14, %c0_15], %21 {strides = array<i32>} : memref<1x512xf32, #tpu.memory_space<vmem>>, vector<1x512xf32>,
    return
  }
  func.func @transform_0(%arg0: i32) -> (i32, i32) {
    %c0_i32 = arith.constant 0 : i32
    %c0_i32_0 = arith.constant 0 : i32
    return %c0_i32, %arg0 : i32, i32
  }
  func.func @transform_1(%arg0: i32) -> (i32, i32) {
    %c0_i32 = arith.constant 0 : i32
    %c0_i32_0 = arith.constant 0 : i32
    %c0_i32_1 = arith.constant 0 : i32
    return %c0_i32, %c0_i32_0 : i32, i32
  }
  func.func @transform_2(%arg0: i32) -> (i32, i32) {
    %c0_i32 = arith.constant 0 : i32
    %c0_i32_0 = arith.constant 0 : i32
    %c0_i32_1 = arith.constant 0 : i32
    return %c0_i32, %c0_i32_0 : i32, i32
  }
  func.func @transform_3(%arg0: i32) -> (i32, i32) {
    %c0_i32 = arith.constant 0 : i32
    %c0_i32_0 = arith.constant 0 : i32
    %c0_i32_1 = arith.constant 0 : i32
    return %c0_i32, %c0_i32_0 : i32, i32
  }
  func.func @transform_4(%arg0: i32) -> (i32, i32) {
    %c0_i32 = arith.constant 0 : i32
    %c0_i32_0 = arith.constant 0 : i32
    %c0_i32_1 = arith.constant 0 : i32
    return %c0_i32, %c0_i32_0 : i32, i32
  }
  func.func @transform_5(%arg0: i32) -> (i32, i32) {
    %c0_i32 = arith.constant 0 : i32
    %c0_i32_0 = arith.constant 0 : i32
    %c0_i32_1 = arith.constant 0 : i32
    return %c0_i32, %c0_i32_0 : i32, i32
  }
  func.func @transform_6(%arg0: i32) -> i32 {
    %c0_i32 = arith.constant 0 : i32
    %c0_i32_0 = arith.constant 0 : i32
    return %c0_i32 : i32
  }
  func.func @transform_7(%arg0: i32) -> (i32, i32) {
    %c0_i32 = arith.constant 0 : i32
    %c0_i32_0 = arith.constant 0 : i32
    return %c0_i32, %arg0 : i32, i32
  }
}

</mosaic_0001>

<bundles_post_ra>
// kernel: tpu_custom_call.1
= control target key start
LH: loop header
LB: loop body
LE: loop exit
PB: predicated region body
PF: predicated region fallthrough
CT: control target
= control target key end

     0   :  { %vm86_vm0 = vcmask 1043456   ;;  %v645_v6 = vmov 0   ;;  %vm79_vm1 = vcmask 64512   ;;  %s771_s0 = inlined_call_operand.vmem [shape: bf16[8,8], index: 0, kind: input, shape index: {}]   ;;  %s772_s1 = inlined_call_operand.vmem [shape: bf16[32,8], index: 1, kind: input, shape index: {}]   ;;  %s773_s2 = inlined_call_operand.vmem [shape: f32[32,1], index: 2, kind: input, shape index: {}]   ;;  %s774_s3 = inlined_call_operand.vmem [shape: bf16[32,32], index: 3, kind: input, shape index: {}]   ;;  %s775_s4 = inlined_call_operand.vmem [shape: f32[32,1], index: 4, kind: input, shape index: {}]   ;;  %s776_s5 = inlined_call_operand.vmem [shape: f32[32,1], index: 5, kind: input, shape index: {}]   ;;  %s777_s6 = inlined_call_operand.<no memory space> [shape: f32[1], index: 6, kind: input, shape index: {}]   ;;  %s778_s7 = inlined_call_operand.hbm [shape: f32[1,512], index: 7, kind: output, shape index: {}]  }
   0x1   :  { %v33_v0 = vld [vmem:[%s771_s0] sm:$0xff]  ;;  %v34_v1 = vld [vmem:[%s771_s0 + $0x8] sm:$0xff]  ;;  %131 = vmatprep.mubr.bf16.mxu0 %v645_v6  ;;  %184 = vmatprep.mubr.bf16.mxu1 %v645_v6  ;;  %v37_v11 = vld [vmem:[%s773_s2 + $0x10] sm:$0xff] }
   0x2   :  { %v529_v2 = vcombine.high %v33_v0, %v33_v0  ;;  %v531_v3 = vcombine.high %v34_v1, %v34_v1  ;;  %v528_v4 = vcombine.low %v33_v0, %v33_v0  ;;  %v530_v5 = vcombine.low %v34_v1, %v34_v1  ;;  %547 = vset.pattern.permute.xlu0 %v645_v6  ;;  %v35_v7 = vld [vmem:[%s773_s2] sm:$0xff]  ;;  %v36_v12 = vld [vmem:[%s773_s2 + $0x8] sm:$0xff]  ;;  %v38_v13 = vld [vmem:[%s773_s2 + $0x18] sm:$0xff] }
   0x3   :  { %v553_v10 = vld [vmem:[%s772_s1] sm:$0xff]   ;;  %41 = vperm.xlu0 %547, %v35_v7   ;;  %548 = vset.pattern.permute.xlu1 %v645_v6 }
   0x4   :  { %532 = vmatprep.subr.msk.bf16.mxu0 %vm86_vm0, %v529_v2  ;;  %535 = vmatprep.subr.msk.bf16.mxu1 %vm86_vm0, %v531_v3  ;;  %v88_v8 = vsel %vm86_vm0, %v528_v4, 0  ;;  %v94_v9 = vsel %vm86_vm0, %v530_v5, 0 }
   0x5   :  { %100 = vmatpush1.bf16.msra.mxu0 %v88_v8  ;;  %153 = vmatpush1.bf16.msra.mxu1 %v94_v9 }
   0x6   :  { %51 = vperm.xlu1 %548, %v37_v11  }
   0x8   :  { %533 = vmatmul.mubr.msk.bf16.vlgmr.msra.gmra.mrb[0].mxu0 %vm79_vm1, %v553_v10  ;;  %536 = vmatmul.mubr.msk.bf16.vlgmr.msra.gmra.mrb[0].mxu1 %vm79_vm1, %v553_v10 }
   0x9   :  { %141 = vmatprep.mubr.bf16.mxu0 %v645_v6  ;;  %194 = vmatprep.mubr.bf16.mxu1 %v645_v6 }
   0xa   :  { %13 = vsyncpa [#allocation4], 0  ;;  %46 = vperm.xlu0 %547, %v36_v12   ;;  %v233_v14 = vld [vmem:[%s775_s4] sm:$0xff]  ;;  %56 = vperm.xlu1 %548, %v38_v13   ;;  %v554_v15 = vld [vmem:[%s772_s1 + $0x8] sm:$0xff]   ;;  %vm267_vm2 = vcmask 261120   ;;  %s647_s9 = smov [#allocation3]  }
   0xb   :  { %v234_v16 = vld [vmem:[%s775_s4 + $0x8] sm:$0xff]  ;;  %v235_v17 = vld [vmem:[%s775_s4 + $0x10] sm:$0xff]  ;;  %v236_v18 = vld [vmem:[%s775_s4 + $0x18] sm:$0xff]  ;;  %s518_s10 = sshll.u32 %s647_s9, 4  ;;  %s519_s10 = int_to_ptr.vmem [resolvable:$true] %s518_s10 }
   0xc   :  { %v396_v19 = vld [vmem:[%s776_s5] sm:$0xff]  ;;  %v397_v20 = vld [vmem:[%s776_s5 + $0x8] sm:$0xff]  ;;  %v398_v21 = vld [vmem:[%s776_s5 + $0x10] sm:$0xff]  ;;  %p626_p1 = scmp.lt.s32.totalorder %s519_s10, %s519_s10 }
   0xd   :  { %v399_v22 = vld [vmem:[%s776_s5 + $0x18] sm:$0xff] }
   0xe   :  { %239 = vperm.xlu0 %547, %v233_v14   ;;  %244 = vperm.xlu1 %548, %v234_v16  }
  0x10   :  { %534 = vmatmul.mubr.msk.bf16.gmra.mrb[4].mxu0 %vm79_vm1, %v554_v15  ;;  %537 = vmatmul.mubr.msk.bf16.gmra.mrb[4].mxu1 %vm79_vm1, %v554_v15 }
  0x11   :  { %306 = vmatprep.mubr.bf16.mxu0 %v645_v6  ;;  %359 = vmatprep.mubr.bf16.mxu1 %v645_v6 }
  0x12   :  { %249 = vperm.xlu0 %547, %v235_v17   ;;  %254 = vperm.xlu1 %548, %v236_v18  }
  0x16   :  { %402 = vperm.xlu0 %547, %v396_v19   ;;  %407 = vperm.xlu1 %548, %v397_v20   ;;  %v555_v20 = vld [vmem:[%s774_s3] sm:$0xff]  }
  0x1a   :  { %412 = vperm.xlu0 %547, %v398_v21   ;;  %417 = vperm.xlu1 %548, %v399_v22   ;;  %v556_v21 = vld [vmem:[%s774_s3 + $0x8] sm:$0xff]  }
  0x82   :  { %v42_v23 = vpop.permute.xlu0 %41 }
  0x85   :  { %v52_v25 = vpop.permute.xlu1 %51 }
  0x89   :  { %v47_v24 = vpop.permute.xlu0 %46  ;;  %v57_v42 = vpop.permute.xlu1 %56 }
  0x8d   :  { %v240_v22 = vpop.permute.xlu0 %239 }
  0xdb   :  { %v133_v26 = vpop.f32.mrb[0].mxu0  ;;  %v186_v27 = vpop.f32.mrb[0].mxu1 }
  0xdc   :  { %v134_v28 = vadd.f32 %v133_v26, %v42_v23  ;;  %v187_v29 = vadd.f32 %v186_v27, %v42_v23  ;;  %v135_v30 = vpop.f32.mrb[1].mxu0  ;;  %v188_v31 = vpop.f32.mrb[1].mxu1 }
  0xdd   :  { %v136_v32 = vadd.f32 %v135_v30, %v42_v23  ;;  %v189_v33 = vadd.f32 %v188_v31, %v42_v23  ;;  %v137_v34 = vpop.f32.mrb[2].mxu0  ;;  %v190_v35 = vpop.f32.mrb[2].mxu1 }
  0xde   :  { %557 = vtanh.f32 %v134_v28  ;;  %v138_v36 = vadd.f32 %v137_v34, %v47_v24  ;;  %v139_v37 = vpop.f32.mrb[3].mxu0  ;;  %v192_v38 = vpop.f32.mrb[3].mxu1  ;;  %v191_v39 = vadd.f32 %v190_v35, %v47_v24 }
  0xdf   :  { %559 = vtanh.f32 %v187_v29  ;;  %v140_v40 = vadd.f32 %v139_v37, %v47_v24  ;;  %v193_v41 = vadd.f32 %v192_v38, %v47_v24  ;;  %v245_v23 = vpop.permute.xlu1 %244 }
  0xe0   :  { %561 = vtanh.f32 %v136_v32 }
  0xe1   :  { %563 = vtanh.f32 %v189_v33 }
  0xe2   :  { %565 = vtanh.f32 %v138_v36 }
  0xe3   :  { %567 = vtanh.f32 %v191_v39  ;;  %v143_v43 = vpop.f32.mrb[4].mxu0  ;;  %v196_v44 = vpop.f32.mrb[4].mxu1 }
  0xe4   :  { %569 = vtanh.f32 %v140_v40  ;;  %v144_v45 = vadd.f32 %v143_v43, %v52_v25  ;;  %v197_v46 = vadd.f32 %v196_v44, %v52_v25  ;;  %v145_v47 = vpop.f32.mrb[5].mxu0  ;;  %v198_v48 = vpop.f32.mrb[5].mxu1 }
  0xe5   :  { %571 = vtanh.f32 %v193_v41  ;;  %v146_v49 = vadd.f32 %v145_v47, %v52_v25  ;;  %v199_v50 = vadd.f32 %v198_v48, %v52_v25  ;;  %v147_v51 = vpop.f32.mrb[6].mxu0  ;;  %v200_v52 = vpop.f32.mrb[6].mxu1 }
  0xe6   :  { %573 = vtanh.f32 %v144_v45  ;;  %v148_v53 = vadd.f32 %v147_v51, %v57_v42  ;;  %v149_v54 = vpop.f32.mrb[7].mxu0  ;;  %v202_v55 = vpop.f32.mrb[7].mxu1  ;;  %v201_v56 = vadd.f32 %v200_v52, %v57_v42 }
  0xe7   :  { %575 = vtanh.f32 %v197_v46  ;;  %v150_v58 = vadd.f32 %v149_v54, %v57_v42  ;;  %v203_v60 = vadd.f32 %v202_v55, %v57_v42  ;;  %v250_v39 = vpop.permute.xlu0 %249  ;;  %v255_v40 = vpop.permute.xlu1 %254 }
  0xe8   :  { %v558_v57 = vpop.eup %557  ;;  %577 = vtanh.f32 %v146_v49 }
  0xe9   :  { %v560_v59 = vpop.eup %559  ;;  %579 = vtanh.f32 %v199_v50 }
  0xea   :  { %v562_v61 = vpop.eup %561  ;;  %581 = vtanh.f32 %v148_v53 }
  0xeb   :  { %v564_v62 = vpop.eup %563  ;;  %583 = vtanh.f32 %v201_v56 }
  0xec   :  { %v566_v63 = vpop.eup %565  ;;  %585 = vtanh.f32 %v150_v58 }
  0xed   :  { %v568_v0 = vpop.eup %567  ;;  %587 = vtanh.f32 %v203_v60  ;;  %v225_v1 = vpack.c.bf16 %v566_v63, %v558_v57  ;;  %v403_v60 = vpop.permute.xlu0 %402 }
  0xee   :  { %v570_v2 = vpop.eup %569  ;;  %v227_v3 = vpack.c.bf16 %v568_v0, %v560_v59  ;;  %v408_v63 = vpop.permute.xlu1 %407 }
  0xef   :  { %v572_v4 = vpop.eup %571  ;;  %v226_v5 = vpack.c.bf16 %v570_v2, %v562_v61 }
  0xf0   :  { %v574_v7 = vpop.eup %573  ;;  %v228_v8 = vpack.c.bf16 %v572_v4, %v564_v62 }
  0xf1   :  { %v576_v9 = vpop.eup %575  ;;  %274 = vmatprep.subr.bf16.mxu0 %v226_v5 }
  0xf2   :  { %v578_v10 = vpop.eup %577  ;;  %327 = vmatprep.subr.bf16.mxu1 %v228_v8  ;;  %275 = vmatpush1.bf16.msra.mxu0 %v225_v1 }
  0xf3   :  { %v580_v11 = vpop.eup %579  ;;  %328 = vmatpush1.bf16.msra.mxu1 %v227_v3 }
  0xf4   :  { %v582_v12 = vpop.eup %581 }
  0xf5   :  { %v584_v13 = vpop.eup %583  ;;  %v229_v14 = vpack.c.bf16 %v582_v12, %v574_v7  ;;  %v413_v12 = vpop.permute.xlu0 %412 }
  0xf6   :  { %v586_v15 = vpop.eup %585  ;;  %v231_v16 = vpack.c.bf16 %v584_v13, %v576_v9 }
  0xf7   :  { %v588_v17 = vpop.eup %587  ;;  %v230_v18 = vpack.c.bf16 %v586_v15, %v578_v10 }
  0xf8   :  { %v232_v19 = vpack.c.bf16 %v588_v17, %v580_v11 }
  0xf9   :  { %276 = vmatprep.subr.bf16.mxu0 %v230_v18 }
  0xfa   :  { %329 = vmatprep.subr.bf16.mxu1 %v232_v19  ;;  %277 = vmatpush1.bf16.msra.mxu0 %v229_v14 }
  0xfb   :  { %330 = vmatpush1.bf16.msra.mxu1 %v231_v16 }
  0xfd   :  { %540 = vmatmul.mubr.msk.bf16.vlgmr.msra.gmra.mrb[8].mxu0 %vm267_vm2, %v555_v20 }
  0xfe   :  { %542 = vmatmul.mubr.msk.bf16.vlgmr.msra.gmra.mrb[8].mxu1 %vm267_vm2, %v555_v20  ;;  %316 = vmatprep.mubr.bf16.mxu0 %v645_v6 }
  0xff   :  { %369 = vmatprep.mubr.bf16.mxu1 %v645_v6 }
 0x105   :  { %541 = vmatmul.mubr.msk.bf16.gmra.mrb[12].mxu0 %vm267_vm2, %v556_v21 }
 0x106   :  { %543 = vmatmul.mubr.msk.bf16.gmra.mrb[12].mxu1 %vm267_vm2, %v556_v21 }
 0x1d0   :  { %v308_v24 = vpop.f32.mrb[8].mxu0 }
 0x1d1   :  { %v309_v25 = vadd.f32 %v308_v24, %v240_v22  ;;  %v361_v26 = vpop.f32.mrb[8].mxu1  ;;  %v310_v27 = vpop.f32.mrb[9].mxu0 }
 0x1d2   :  { %v362_v28 = vadd.f32 %v361_v26, %v240_v22  ;;  %v311_v29 = vadd.f32 %v310_v27, %v240_v22  ;;  %v363_v30 = vpop.f32.mrb[9].mxu1  ;;  %v312_v31 = vpop.f32.mrb[10].mxu0 }
 0x1d3   :  { %589 = vtanh.f32 %v309_v25  ;;  %v364_v32 = vadd.f32 %v363_v30, %v240_v22  ;;  %v313_v33 = vadd.f32 %v312_v31, %v245_v23  ;;  %v365_v6 = vpop.f32.mrb[10].mxu1  ;;  %v314_v34 = vpop.f32.mrb[11].mxu0 }
 0x1d4   :  { %591 = vtanh.f32 %v362_v28  ;;  %v366_v35 = vadd.f32 %v365_v6, %v245_v23  ;;  %v367_v36 = vpop.f32.mrb[11].mxu1  ;;  %v315_v37 = vadd.f32 %v314_v34, %v245_v23  ;;  %v418_v26 = vpop.permute.xlu1 %417 }
 0x1d5   :  { %593 = vtanh.f32 %v311_v29  ;;  %v368_v38 = vadd.f32 %v367_v36, %v245_v23 }
 0x1d6   :  { %595 = vtanh.f32 %v364_v32 }
 0x1d7   :  { %597 = vtanh.f32 %v313_v33 }
 0x1d8   :  { %599 = vtanh.f32 %v366_v35  ;;  %v318_v41 = vpop.f32.mrb[12].mxu0 }
 0x1d9   :  { %601 = vtanh.f32 %v315_v37  ;;  %v319_v42 = vadd.f32 %v318_v41, %v250_v39  ;;  %v371_v43 = vpop.f32.mrb[12].mxu1  ;;  %v320_v44 = vpop.f32.mrb[13].mxu0 }
 0x1da   :  { %603 = vtanh.f32 %v368_v38  ;;  %v372_v45 = vadd.f32 %v371_v43, %v250_v39  ;;  %v321_v46 = vadd.f32 %v320_v44, %v250_v39  ;;  %v373_v47 = vpop.f32.mrb[13].mxu1  ;;  %v322_v48 = vpop.f32.mrb[14].mxu0 }
 0x1db   :  { %605 = vtanh.f32 %v319_v42  ;;  %v374_v49 = vadd.f32 %v373_v47, %v250_v39  ;;  %v323_v50 = vadd.f32 %v322_v48, %v255_v40  ;;  %v375_v51 = vpop.f32.mrb[14].mxu1  ;;  %v324_v52 = vpop.f32.mrb[15].mxu0 }
 0x1dc   :  { %607 = vtanh.f32 %v372_v45  ;;  %v376_v53 = vadd.f32 %v375_v51, %v255_v40  ;;  %v377_v54 = vpop.f32.mrb[15].mxu1  ;;  %v325_v56 = vadd.f32 %v324_v52, %v255_v40 }
 0x1dd   :  { %v590_v55 = vpop.eup %589  ;;  %609 = vtanh.f32 %v321_v46  ;;  %v378_v58 = vadd.f32 %v377_v54, %v255_v40 }
 0x1de   :  { %v592_v57 = vpop.eup %591  ;;  %611 = vtanh.f32 %v374_v49  ;;  %v420_v1 = vmul.f32 %v590_v55, %v403_v60  ;;  %v487_v55 = vlaneseq }
 0x1df   :  { %v594_v59 = vpop.eup %593  ;;  %613 = vtanh.f32 %v323_v50  ;;  %v422_v4 = vmul.f32 %v592_v57, %v403_v60 }
 0x1e0   :  { %v596_v61 = vpop.eup %595  ;;  %615 = vtanh.f32 %v376_v53  ;;  %v421_v8 = vmul.f32 %v594_v59, %v403_v60  ;;  %v646_v53 = vmov 1966171168   ;;  %vm509_vm3 = vcmp.lt.s32.totalorder %v487_v55, 512 }
 0x1e1   :  { %v598_v62 = vpop.eup %597  ;;  %617 = vtanh.f32 %v325_v56  ;;  %v423_v13 = vmul.f32 %v596_v61, %v403_v60  ;;  %v485_v54 = vunpack.c.l.s4 %v646_v53 }
 0x1e2   :  { %v600_v0 = vpop.eup %599  ;;  %v424_v2 = vmul.f32 %v598_v62, %v408_v63  ;;  %619 = vtanh.f32 %v378_v58  ;;  %v473_v62 = vstv %s777_s6  ;;  %s621_s6 = scalar_lea.vmem %s519_s10, 64 }
 0x1e3   :  { %v602_v3 = vpop.eup %601  ;;  %v426_v5 = vmul.f32 %v600_v0, %v408_v63  ;;  %p622_p0 = scmp.ne.s32.totalorder %s519_s10, %s621_s6  ;;  %p627_p2 = scmp.lt.s32.totalorder %s621_s6, %s621_s6 }
 0x1e4   :  { %v604_v7 = vpop.eup %603  ;;  %v436_v9 = vadd.f32 %v424_v2, %v420_v1  ;;  %v425_v10 = vmul.f32 %v602_v3, %v408_v63  ;;  %v486_v1 = vunpack.c.0.s8 %v485_v54  ;;  %v488_v2 = vshrl.u32 %v487_v55, 7 }
 0x1e5   :  { %v606_v11 = vpop.eup %605  ;;  %v454_v14 = vadd.f32 %v426_v5, %v422_v4  ;;  %v427_v15 = vmul.f32 %v604_v7, %v408_v63  ;;  %p628_p3 = por %p627_p2, %p626_p1 }
 0x1e6   :  { %v608_v16 = vpop.eup %607  ;;  %v445_v17 = vadd.f32 %v425_v10, %v421_v8  ;;  %v428_v18 = vmul.f32 %v606_v11, %v413_v12  ;;  %v489_v11 = vsub.s32 %v486_v1, %v488_v2 }
 0x1e7   :  { %v610_v19 = vpop.eup %609  ;;  %v463_v20 = vadd.f32 %v427_v15, %v423_v13  ;;  %v430_v21 = vmul.f32 %v608_v16, %v413_v12  ;;  %p629_p4 = pnand %p628_p3, %p622_p0 }
 0x1e8   :  { %v612_v22 = vpop.eup %611  ;;  %v437_v23 = vadd.f32 %v436_v9, %v428_v18  ;;  %v429_v24 = vmul.f32 %v610_v19, %v413_v12 }
 0x1e9   :  { %v614_v25 = vpop.eup %613  ;;  %v455_v27 = vadd.f32 %v454_v14, %v430_v21  ;;  %v431_v28 = vmul.f32 %v612_v22, %v413_v12 }
 0x1ea   :  { %v616_v29 = vpop.eup %615  ;;  %v446_v30 = vadd.f32 %v445_v17, %v429_v24  ;;  %v432_v31 = vmul.f32 %v614_v25, %v418_v26 }
 0x1eb   :  { %v618_v32 = vpop.eup %617  ;;  %v464_v33 = vadd.f32 %v463_v20, %v431_v28  ;;  %v434_v6 = vmul.f32 %v616_v29, %v418_v26 }
 0x1ec   :  { %v620_v34 = vpop.eup %619  ;;  %v438_v35 = vadd.f32 %v437_v23, %v432_v31  ;;  %v433_v36 = vmul.f32 %v618_v32, %v418_v26 }
 0x1ed   :  { %v456_v37 = vadd.f32 %v455_v27, %v434_v6  ;;  %v435_v38 = vmul.f32 %v620_v34, %v418_v26 }
 0x1ee   :  { %v439_v39 = vrot.slane %v438_v35, 4  ;;  %v447_v40 = vadd.f32 %v446_v30, %v433_v36 }
 0x1ef   :  { %v457_v41 = vrot.slane %v456_v37, 4  ;;  %v465_v42 = vadd.f32 %v464_v33, %v435_v38 }
 0x1f0   :  { %v440_v43 = vadd.f32 %v439_v39, %v438_v35  ;;  %v448_v44 = vrot.slane %v447_v40, 4 }
 0x1f1   :  { %v458_v45 = vadd.f32 %v457_v41, %v456_v37  ;;  %v466_v46 = vrot.slane %v465_v42, 4 }
 0x1f2   :  { %v449_v47 = vadd.f32 %v448_v44, %v447_v40  ;;  %v441_v48 = vrot.slane %v440_v43, 2 }
 0x1f3   :  { %v467_v49 = vadd.f32 %v466_v46, %v465_v42  ;;  %v459_v50 = vrot.slane %v458_v45, 2 }
 0x1f4   :  { %v442_v51 = vadd.f32 %v441_v48, %v440_v43  ;;  %v450_v52 = vrot.slane %v449_v47, 2 }
 0x1f5   :  { %v460_v56 = vadd.f32 %v459_v50, %v458_v45  ;;  %v468_v57 = vrot.slane %v467_v49, 2 }
 0x1f6   :  { %v443_v58 = vrot.slane %v442_v51, 1  ;;  %v451_v59 = vadd.f32 %v450_v52, %v449_v47 }
 0x1f7   :  { %v461_v60 = vrot.slane %v460_v56, 1  ;;  %v469_v61 = vadd.f32 %v468_v57, %v467_v49 }
 0x1f8   :  { %v444_v63 = vadd.f32 %v443_v58, %v442_v51  ;;  %v452_v0 = vrot.slane %v451_v59, 1 }
 0x1f9   :  { %v462_v3 = vadd.f32 %v461_v60, %v460_v56  ;;  %v470_v4 = vrot.slane %v469_v61, 1 }
 0x1fa   :  { %v453_v5 = vadd.f32 %v452_v0, %v451_v59  ;;  %v474_v7 = vadd.f32 %v473_v62, %v444_v63 }
 0x1fb   :  { %v471_v8 = vadd.f32 %v470_v4, %v469_v61  ;;  %v476_v9 = vadd.f32 %v473_v62, %v462_v3 }
 0x1fc   :  { %v475_v10 = vadd.f32 %v473_v62, %v453_v5 }
 0x1fd   :  { %v477_v12 = vadd.f32 %v473_v62, %v471_v8 }
 0x1fe   :  { %v482_v13 = vcombine.low %v474_v7, %v475_v10 }
 0x1ff   :  { %v483_v14 = vcombine.low %v476_v9, %v477_v12 }
 0x200   :  { %v490_v15 = vrot.slane %v482_v13, %v489_v11 }
 0x201   :  { %v497_v16 = vrot.slane %v483_v14, %v489_v11 }
 0x203   :  { %v498_v17 = vcombine.low %v490_v15, %v497_v16 }
 0x205   :  { %v505_v18 = vrot.slane %v498_v17, %v489_v11 }
 0x207   :  { %511 = vst.msk [vmem:[#allocation3] sm:$0xf] %vm509_vm3, %v505_v18 }
 0x208   :  { %632 = shalt.err (!%p629_p4)
}
 0x209   :  { %s633_s13 = scalar_lea.hbm %s778_s7, 64 }
 0x20a   :  { %p634_p5 = scmp.ne.s32.totalorder %s778_s7, %s633_s13  ;;  %p637_p6 = scmp.lt.u32.totalorder %s633_s13, %s778_s7 }
 0x20c   :  { %p639_p7 = pnand %p637_p6, %p634_p5 }
 0x20e   :  { %642 = shalt.err (!%p639_p7)
}
 0x20f   :  { %521 = dma.vmem_to_hbm [thread:$0]  %s519_s10, 64, %s778_s7, [#allocation4]  }
 0x210   :  { %643 = dma.done.wait [#allocation4], 64  }
 0x211   :  { %644 = vsyncadd [#allocation4], 4294967232 }
 0x212   :  { %525 = vsyncpa [#allocation4], 1 }

</bundles_post_ra>
